<compile_context>
chip_gen: v6e
topology: v6e:2x2x1
jax: 0.10.0
libtpu: 0.0.40
codegen_flags: <defaults>
</compile_context>

<pallas_src>
import jax
import jax.numpy as jnp
from jax.experimental import pallas as pl
from jax.experimental.pallas import tpu as pltpu

_LANE = 128
_SUBL = 8


def _cdiv(a, b):
    return -(-a // b)


def _csse_scale_kernel(x_ref, s_ref, wb_ref, o_ref):
    """Fused sSE (1x1 conv + sigmoid + scale), cSE scale, and element-wise max.

    x_ref:  (Bt, C, S, 128)  input block (native dtype); sublane/lane axes are spatial.
    s_ref:  (Bt, C, 1, 1)    cSE gate (already sigmoid'ed, native dtype).
    wb_ref: (C + 1,)         SMEM f32 scalars: sSE conv weight per channel, then the bias.
    o_ref:  (Bt, C, S, 128)  output block.
    """
    x = x_ref[...]
    s = s_ref[...]
    C = x.shape[1]

    # sSE logit: sum_c w[c] * x[:, c] + b, accumulated one channel at a time so the only f32
    # temporary is the (Bt, S, 128) accumulator (weights are SMEM scalars, no broadcast array).
    logit = x[:, 0].astype(jnp.float32) * wb_ref[0]
    for c in range(1, C):
        logit = logit + x[:, c].astype(jnp.float32) * wb_ref[c]
    logit = logit + wb_ref[C]
    q = jax.nn.sigmoid(logit).astype(x.dtype)            # (Bt, S, 128)

    # Concurrent SE: max(channel-gated, spatially-gated).
    o_ref[...] = jnp.maximum(x * s, x * q[:, None]).astype(o_ref.dtype)


def _plan_tiles(B, C, HW, itemsize, target_block_bytes):
    """Pick (Bt, S, P): batch block, spatial rows per block, padded total rows per batch."""
    row_bytes = C * _LANE * itemsize                      # one 128-pixel row, all channels
    p_min = _cdiv(HW, _LANE)                              # rows needed to cover HW
    s_target = max(_SUBL, target_block_bytes // row_bytes)

    if p_min <= s_target:
        # Whole spatial extent fits in one block -> pack batches per grid step instead.
        P = p_min
        bt_cap = max(1, target_block_bytes // max(1, P * row_bytes))
        Bt = 1
        for d in range(min(B, bt_cap), 0, -1):
            if B % d == 0:
                Bt = d
                break
        if Bt == B and B > 1:
            # Keep >= 2 grid steps so both v7x TensorCores get work.
            Bt = next(d for d in range(B // 2, 0, -1) if B % d == 0)
        return Bt, P, P

    # Tile the spatial axis: prefer a multiple-of-8 divisor of the 8-padded row count (minimal
    # padding); fall back to padding up to a full block if the best divisor is too small.
    p8 = _cdiv(p_min, _SUBL) * _SUBL
    best = _SUBL
    for d in range(1, int(p8 ** 0.5) + 1):
        if p8 % d == 0:
            for cand in (d, p8 // d):
                if cand % _SUBL == 0 and cand <= s_target and cand > best:
                    best = cand
    if 4 * best >= s_target:
        return 1, best, p8
    S = (s_target // _SUBL) * _SUBL
    return 1, S, _cdiv(p_min, S) * S


def channel_spatial_se_layer(x, w1, b1, w2, b2, w_sp, b_sp, *,
                             target_block_bytes=2 * 1024 * 1024):
    """x: (B, C, H, W).  w1: (C, C//r), b1: (C//r,), w2: (C//r, C), b2: (C,)  [cSE MLP,
    (in, out) layout].  w_sp: (C,), b_sp: (1,)  [sSE 1x1 conv].  Returns (B, C, H, W)."""
    B, C, H, W = x.shape
    HW = H * W
    itemsize = jnp.dtype(x.dtype).itemsize
    x3 = x.reshape(B, C, HW)

    # ---- Phase 1 (XLA, tiny): channel squeeze + excitation MLP -> per-(b, c) cSE gate --------
    # TODO(synk): inside a larger jit this read of x fuses into x's producer; standalone it is a
    # second full read of x (~3x total HBM traffic for the layer), reflected in cost_estimate.
    sq = jnp.sum(x3.astype(jnp.float32), axis=2) * jnp.float32(1.0 / HW)        # (B, C)
    h = jax.nn.relu(sq @ w1.astype(jnp.float32) + b1.astype(jnp.float32))       # (B, C//r)
    s = jax.nn.sigmoid(h @ w2.astype(jnp.float32) + b2.astype(jnp.float32))     # (B, C)
    s4 = s.astype(x.dtype).reshape(B, C, 1, 1)

    # ---- Phase 2 (Pallas): tiled, pipelined fused rescale pass -------------------------------
    target_block_bytes = min(int(target_block_bytes), 12 * 1024 * 1024)  # 4 bufs stay << 48 MiB
    Bt, S, P = _plan_tiles(B, C, HW, itemsize, target_block_bytes)
    hw_pad = P * _LANE
    if hw_pad != HW:
        x3 = jnp.pad(x3, ((0, 0), (0, 0), (0, hw_pad - HW)))
    x4 = x3.reshape(B, C, P, _LANE)

    grid = (B // Bt, P // S)
    block_bytes = Bt * C * S * _LANE * itemsize
    # in + out, double-buffered, plus tiny gate/weight buffers; clamped for v7x's 64 MiB VMEM.
    vmem_limit = int(min(48 * 1024 * 1024,
                         max(32 * 1024 * 1024, 4 * block_bytes + (1 << 20))))

    wb = jnp.concatenate([w_sp.reshape(C).astype(jnp.float32),
                          b_sp.reshape(1).astype(jnp.float32)])

    kernel = pl.pallas_call(
        _csse_scale_kernel,
        out_shape=jax.ShapeDtypeStruct((B, C, P, _LANE), x.dtype),
        grid_spec=pltpu.PrefetchScalarGridSpec(
            num_scalar_prefetch=0,
            grid=grid,
            in_specs=[
                # x: Bt batches, all channels, S lane-dense spatial rows of 128 pixels.
                pl.BlockSpec((Bt, C, S, _LANE), lambda b, t: (b, 0, t, 0)),
                # cSE gate for these batches (broadcasts over the spatial block).
                pl.BlockSpec((Bt, C, 1, 1), lambda b, t: (b, 0, 0, 0)),
                # sSE conv weight + bias as SMEM scalars.
                pl.BlockSpec(memory_space=pltpu.MemorySpace.SMEM),
            ],
            out_specs=pl.BlockSpec((Bt, C, S, _LANE), lambda b, t: (b, 0, t, 0)),
        ),
        compiler_params=pltpu.CompilerParams(
            dimension_semantics=("parallel", "parallel"),
            vmem_limit_bytes=vmem_limit,
        ),
        cost_estimate=pl.CostEstimate(
            flops=5 * B * C * HW,                       # conv mul+add, two gate muls, max
            transcendentals=B * HW,                     # per-pixel sigmoid
            bytes_accessed=3 * B * C * HW * itemsize,   # 2 reads (phase 1 + kernel) + 1 write
        ),
    )
    out4 = kernel(x4, s4, wb)
    out = out4.reshape(B, C, hw_pad)
    if hw_pad != HW:
        out = out[:, :, :HW]
    return out.reshape(B, C, H, W)


def reference_csse(x, w1, b1, w2, b2, w_sp, b_sp):
    B, C, H, W = x.shape
    sq = x.reshape(B, C, -1).mean(axis=2)
    h = jax.nn.relu(sq @ w1 + b1)
    s = jax.nn.sigmoid(h @ w2 + b2)
    cse = x * s[:, :, None, None]
    logit = jnp.einsum("c,bchw->bhw", w_sp, x) + b_sp[0]
    sse = x * jax.nn.sigmoid(logit)[:, None, :, :]
    return jnp.maximum(cse, sse)


if __name__ == "__main__":
    # Module config: num_channels=4, reduction_ratio=2 -> Cr=2; input (2, 4, 16, 16).
    B, C, H, W = 2, 4, 16, 16
    Cr = C // 2

    key = jax.random.PRNGKey(0)
    kx, k1, k2, k3, k4, k5, k6 = jax.random.split(key, 7)

    x = jax.random.normal(kx, (B, C, H, W), dtype=jnp.float32)

    # PyTorch nn.Linear stores weight as (out, in); here the transposed (in, out) layout is
    # kept so y = x @ W + b directly.  Conv2d(C, 1, 1) weight (1, C, 1, 1) is flattened to (C,).
    w1 = jax.random.normal(k1, (C, Cr), dtype=jnp.float32) * 0.5   # fc1 weight^T
    b1 = jax.random.normal(k2, (Cr,), dtype=jnp.float32) * 0.1     # fc1 bias
    w2 = jax.random.normal(k3, (Cr, C), dtype=jnp.float32) * 0.5   # fc2 weight^T
    b2 = jax.random.normal(k4, (C,), dtype=jnp.float32) * 0.1      # fc2 bias
    w_sp = jax.random.normal(k5, (C,), dtype=jnp.float32) * 0.5    # sSE 1x1 conv weight
    b_sp = jax.random.normal(k6, (1,), dtype=jnp.float32) * 0.1    # sSE 1x1 conv bias

    out = channel_spatial_se_layer(x, w1, b1, w2, b2, w_sp, b_sp)
    out = jax.block_until_ready(out)

    ref = reference_csse(x, w1, b1, w2, b2, w_sp, b_sp)
    assert out.shape == (B, C, H, W)
    assert jnp.allclose(out, ref, atol=1e-5, rtol=1e-5), float(jnp.max(jnp.abs(out - ref)))

    print("KERNEL_OK")
</pallas_src>

<mosaic_0001>
module attributes {stable_mosaic.version = 11 : i64} {
  func.func @_csse_scale_kernel(%arg0: i32, %arg1: i32, %arg2: memref<1x4x2x128xf32, #tpu.memory_space<vmem>>, %arg3: memref<1x4x1x1xf32, #tpu.memory_space<vmem>>, %arg4: memref<5xf32, #tpu.memory_space<smem>>, %arg5: memref<1x4x2x128xf32, #tpu.memory_space<vmem>>) attributes {dimension_semantics = [#tpu.dimension_semantics<parallel>, #tpu.dimension_semantics<parallel>], iteration_bounds = array<i64: 2, 1>, scalar_prefetch = 0 : i64, scratch_operands = 0 : i64, tpu.core_type = #tpu.core_type<tc>, window_params = [{transform_indices = @transform_0, window_bounds = array<i64: 1, 4, 2, 128>}, {transform_indices = @transform_1, window_bounds = array<i64: 1, 4, 1, 1>}, {transform_indices = @transform_2, window_bounds = array<i64: 5>}, {transform_indices = @transform_3, window_bounds = array<i64: 1, 4, 2, 128>}]} {
    %c0 = arith.constant 0 : index
    %c0_0 = arith.constant 0 : index
    %c0_1 = arith.constant 0 : index
    %c0_2 = arith.constant 0 : index
    %0 = vector.load %arg2[%c0, %c0_0, %c0_1, %c0_2] : memref<1x4x2x128xf32, #tpu.memory_space<vmem>>, vector<1x4x2x128xf32>
    %c0_3 = arith.constant 0 : index
    %c0_4 = arith.constant 0 : index
    %c0_5 = arith.constant 0 : index
    %c0_6 = arith.constant 0 : index
    %1 = vector.load %arg3[%c0_3, %c0_4, %c0_5, %c0_6] : memref<1x4x1x1xf32, #tpu.memory_space<vmem>>, vector<1x4x1x1xf32>
    %2 = vector.extract_strided_slice %0 {offsets = [0, 0, 0, 0], sizes = [1, 1, 2, 128], strides = [1, 1, 1, 1]} : vector<1x4x2x128xf32> to vector<1x1x2x128xf32>
    %3 = vector.shape_cast %2 : vector<1x1x2x128xf32> to vector<1x2x128xf32>
    %c0_7 = arith.constant 0 : index
    %4 = memref.load %arg4[%c0_7] : memref<5xf32, #tpu.memory_space<smem>>
    %5 = vector.broadcast %4 : f32 to vector<1x2x128xf32>
    %6 = arith.mulf %3, %5 : vector<1x2x128xf32>
    %7 = vector.extract_strided_slice %0 {offsets = [0, 1, 0, 0], sizes = [1, 1, 2, 128], strides = [1, 1, 1, 1]} : vector<1x4x2x128xf32> to vector<1x1x2x128xf32>
    %8 = vector.shape_cast %7 : vector<1x1x2x128xf32> to vector<1x2x128xf32>
    %c1 = arith.constant 1 : index
    %9 = memref.load %arg4[%c1] : memref<5xf32, #tpu.memory_space<smem>>
    %10 = vector.broadcast %9 : f32 to vector<1x2x128xf32>
    %11 = arith.mulf %8, %10 : vector<1x2x128xf32>
    %12 = arith.addf %6, %11 : vector<1x2x128xf32>
    %13 = vector.extract_strided_slice %0 {offsets = [0, 2, 0, 0], sizes = [1, 1, 2, 128], strides = [1, 1, 1, 1]} : vector<1x4x2x128xf32> to vector<1x1x2x128xf32>
    %14 = vector.shape_cast %13 : vector<1x1x2x128xf32> to vector<1x2x128xf32>
    %c2 = arith.constant 2 : index
    %15 = memref.load %arg4[%c2] : memref<5xf32, #tpu.memory_space<smem>>
    %16 = vector.broadcast %15 : f32 to vector<1x2x128xf32>
    %17 = arith.mulf %14, %16 : vector<1x2x128xf32>
    %18 = arith.addf %12, %17 : vector<1x2x128xf32>
    %19 = vector.extract_strided_slice %0 {offsets = [0, 3, 0, 0], sizes = [1, 1, 2, 128], strides = [1, 1, 1, 1]} : vector<1x4x2x128xf32> to vector<1x1x2x128xf32>
    %20 = vector.shape_cast %19 : vector<1x1x2x128xf32> to vector<1x2x128xf32>
    %c3 = arith.constant 3 : index
    %21 = memref.load %arg4[%c3] : memref<5xf32, #tpu.memory_space<smem>>
    %22 = vector.broadcast %21 : f32 to vector<1x2x128xf32>
    %23 = arith.mulf %20, %22 : vector<1x2x128xf32>
    %24 = arith.addf %18, %23 : vector<1x2x128xf32>
    %c4 = arith.constant 4 : index
    %25 = memref.load %arg4[%c4] : memref<5xf32, #tpu.memory_space<smem>>
    %26 = vector.broadcast %25 : f32 to vector<1x2x128xf32>
    %27 = arith.addf %24, %26 : vector<1x2x128xf32>
    %28 = arith.negf %27 : vector<1x2x128xf32>
    %29 = math.exp %28 : vector<1x2x128xf32>
    %cst = arith.constant 1.000000e+00 : f32
    %30 = vector.broadcast %cst : f32 to vector<1x2x128xf32>
    %31 = arith.addf %30, %29 : vector<1x2x128xf32>
    %32 = arith.divf %30, %31 : vector<1x2x128xf32>
    %33 = vector.broadcast %1 : vector<1x4x1x1xf32> to vector<1x4x2x128xf32>
    %34 = arith.mulf %0, %33 : vector<1x4x2x128xf32>
    %35 = vector.shape_cast %32 : vector<1x2x128xf32> to vector<1x1x2x128xf32>
    %36 = vector.broadcast %35 : vector<1x1x2x128xf32> to vector<1x4x2x128xf32>
    %37 = arith.mulf %0, %36 : vector<1x4x2x128xf32>
    %38 = arith.maximumf %34, %37 : vector<1x4x2x128xf32>
    %c0_8 = arith.constant 0 : index
    %c0_9 = arith.constant 0 : index
    %c0_10 = arith.constant 0 : index
    %c0_11 = arith.constant 0 : index
    %39 = vector.load %arg5[%c0_8, %c0_9, %c0_10, %c0_11] : memref<1x4x2x128xf32, #tpu.memory_space<vmem>>, vector<1x4x2x128xf32>
    tpu.vector_store %arg5[%c0_8, %c0_9, %c0_10, %c0_11], %38 {strides = array<i32>} : memref<1x4x2x128xf32, #tpu.memory_space<vmem>>, vector<1x4x2x128xf32>,
    return
  }
  func.func @transform_0(%arg0: i32, %arg1: i32) -> (i32, i32, i32, i32) {
    %c0_i32 = arith.constant 0 : i32
    %c0_i32_0 = arith.constant 0 : i32
    %c0_i32_1 = arith.constant 0 : i32
    return %arg0, %c0_i32, %arg1, %c0_i32_0 : i32, i32, i32, i32
  }
  func.func @transform_1(%arg0: i32, %arg1: i32) -> (i32, i32, i32, i32) {
    %c0_i32 = arith.constant 0 : i32
    %c0_i32_0 = arith.constant 0 : i32
    %c0_i32_1 = arith.constant 0 : i32
    %c0_i32_2 = arith.constant 0 : i32
    return %arg0, %c0_i32, %c0_i32_0, %c0_i32_1 : i32, i32, i32, i32
  }
  func.func @transform_2(%arg0: i32, %arg1: i32) -> i32 {
    %c0_i32 = arith.constant 0 : i32
    %c0_i32_0 = arith.constant 0 : i32
    return %c0_i32 : i32
  }
  func.func @transform_3(%arg0: i32, %arg1: i32) -> (i32, i32, i32, i32) {
    %c0_i32 = arith.constant 0 : i32
    %c0_i32_0 = arith.constant 0 : i32
    %c0_i32_1 = arith.constant 0 : i32
    return %arg0, %c0_i32, %arg1, %c0_i32_0 : i32, i32, i32, i32
  }
}

</mosaic_0001>

<bundles_post_ra>
// kernel: tpu_custom_call.1
= control target key start
LH: loop header
LB: loop body
LE: loop exit
PB: predicated region body
PF: predicated region fallthrough
CT: control target
= control target key end

     0   :  { %s913_s0 = inlined_call_operand.hbm [shape: f32[2,4,2,128], index: 0, kind: input, shape index: {}]   ;;  %s914_s1 = inlined_call_operand.vmem [shape: f32[2,4,1,1], index: 1, kind: input, shape index: {}]   ;;  %s915_s2 = inlined_call_operand.vmem [shape: f32[5], index: 2, kind: input, shape index: {}]   ;;  %s916_s3 = inlined_call_operand.hbm [shape: f32[2,4,2,128], index: 3, kind: output, shape index: {}]  }
   0x1   :  { %918 = sst [smem:[#allocation11_spill]] %s915_s2 }
   0x2   :  { %8 = vsyncpa [#allocation3], 0 }
   0x3   :  { %10 = vsyncpa [#allocation3 + $0x1], 0 }
   0x4   :  { %11 = vsyncpa [#allocation5], 0 }
   0x5   :  { %12 = vsyncpa [#allocation4], 0 }
   0x6   :  { %14 = vsyncpa [#allocation4 + $0x1], 0  ;;  %s715_s12 = smov 0   ;;  %s717_s13 = smov 0  }
   0x7   :  { %s719_s14 = smov 0   ;;  %s721_s15 = smov 0  }
   0x8   :  { %s723_s16 = smov 0   ;;  %s725_s17 = smov 0  }
   0x9 LB: > { %s445_s18 = sadd.s32 4294967295, %s685_s17   ;;  %s446_s19 = sadd.s32 4294967294, %s685_s17   ;;  %s685_s17 = sphi %s725_s17, %s20_s17   ;;  %s681_s16 = sphi %s723_s16, %s936_s16   ;;  %s677_s15 = sphi %s721_s15, %s935_s15   ;;  %s673_s14 = sphi %s719_s14, %s934_s14   ;;  %s669_s13 = sphi %s717_s13, %s933_s13   ;;  %s665_s12 = sphi %s715_s12, %s932_s12  }
   0xa   : > { %s41_s20 = sadd.s32 1, %s673_s14  ;;  %p48_p0 = scmp.ne.s32.totalorder %s673_s14, %s669_s13 }
   0xb   : > { %p49_p1 = scmp.eq.s32.totalorder %s685_s17, 0  ;;  %p54_p2 = scmp.ne.s32.totalorder %s669_s13, %s665_s12 }
   0xc   : > { %p753_p3 = scmp.eq.s32.totalorder %s445_s18, 0  ;;  %p127_p4 = scmp.eq.s32.totalorder %s445_s18, 1 }
   0xd   : > { %p757_p5 = por %p49_p1, %p48_p0  ;;  %p133_p6 = scmp.eq.s32.totalorder %s446_s19, 1 }
   0xe   : > { %p763_p7 = por %p753_p3, %p54_p2  ;;  %p767_p8 = por %p127_p4, %p48_p0 }
   0xf   : > { %p771_p9 = por %p133_p6, %p54_p2  ;;  %p447_p10 = scmp.ge.s32.totalorder %s685_s17, 1 }
  0x10   : > { %s922_s24 = scalar_select %p767_p8, 1, 0 }
  0x11   : > { %s923_s25 = scalar_select %p771_p9, 1, 0 }
  0x12   : > { %p140_p11 = scmp.lt.s32.totalorder %s685_s17, 3  ;;  %s924_s2 = sld [smem:[#allocation11_spill]] }
  0x13   : > { %p495_p0 = scmp.lt.s32.totalorder %s685_s17, 2  ;;  %s32_s5 = sadd.s32 1, %s681_s16 }
  0x14   : > { %p780_p12 = pnand %p447_p10, %p140_p11  ;;  %p801_p6 = scmp.ge.s32.totalorder %s32_s5, 2 }
  0x15   : > { %p790_p2 = pnand %p495_p0, %p757_p5  ;;  %s164_s7 = sand.u32 1, %s673_s14  }
  0x16   : > { %p482_p1 = pneg %p780_p12 }
  0x18   : > { %s153_s28 = sshll.u32 %s924_s2, 4  ;;  %p796_p4 = pnand %p482_p1, %p753_p3  ;;  %s154_s28 = int_to_ptr.vmem [resolvable:$true] %s153_s28 }
  0x19   : > { %s558_s8 = scalar_lea.vmem %s154_s28, 16  ;;  %p566_p13 = scmp.lt.s32.totalorder %s154_s28, %s154_s28 }
  0x1a   : > { %p559_p10 = scmp.ne.s32.totalorder %s154_s28, %s558_s8  ;;  %p560_p11 = pneg %p796_p4 }
  0x1b   : > { %p567_p9 = scmp.lt.s32.totalorder %s558_s8, %s558_s8 }
  0x1c   : > { %p561_p5 = pnand %p560_p11, %p559_p10 }
  0x1d   : > { %p568_p8 = por %p567_p9, %p566_p13 }
  0x1e   : > { %p562_p0 = pneg %p561_p5 }
  0x20   : > { %p569_p1 = pnand %p568_p8, %p562_p0 }
  0x22   : > { %572 = shalt.err (!%p569_p1)
}
  0x23   : > { %s687_s9 = smov [#allocation6]   ;;  %s938_s5 = smov (%p801_p6, %s32_s5), 0 }
  0x24   : > { %485 = dma.vmem_to_smem (!%p796_p4), %s154_s28, 16, %s687_s9, [#allocation5]  }
  0x25   : > { %s450_s10 = sshll.u32 %s164_s7, 3  ;;  %s36_s11 = ssub.s32 %s681_s16, %s938_s5 }
  0x26   : > { %p39_p10 = scmp.eq.s32.totalorder %s36_s11, 0  ;;  %s472_s18 = sshll.u32 %s681_s16, 7 }
  0x27   : > { %s175_s26 = scalar_lea.hbm %s913_s0, %s472_s18  ;;  %s168_s27 = scalar_lea.vmem [#allocation2], %s450_s10 }
  0x28   : > { %s176_s4 = sshll.u32 %s168_s27, 4  ;;  %s165_s2 = scalar_lea.sflag [#allocation3], %s164_s7  ;;  %s177_s4 = int_to_ptr.vmem [resolvable:$true] %s176_s4 }
  0x29   : > { %s823_s8 = scalar_select %p39_p10, %s673_s14, %s41_s20  }
  0x2a   : > { %p575_p8 = pneg %p790_p2  ;;  %s586_s28 = scalar_lea.vmem %s177_s4, 128 }
  0x2b   : > { %p587_p9 = scmp.ne.s32.totalorder %s177_s4, %s586_s28  ;;  %s688_s6 = smov [#allocation2]  }
  0x2c   : > { %s591_s9 = sshll.u32 %s688_s6, 4  ;;  %s592_s9 = int_to_ptr.vmem [resolvable:$false] %s591_s9 }
  0x2d   : > { %p589_p13 = pnand %p587_p9, %p575_p8  ;;  %s593_s11 = scalar_lea.vmem %s592_s9, 256 }
  0x2e   : > { %p594_p6 = scmp.lt.s32.totalorder %s177_s4, %s592_s9  ;;  %p595_p11 = scmp.lt.s32.totalorder %s593_s11, %s586_s28 }
  0x2f   : > { %p590_p4 = pneg %p589_p13 }
  0x30   : > { %p596_p5 = por %p595_p11, %p594_p6 }
  0x32   : > { %p597_p0 = pnand %p596_p5, %p590_p4 }
  0x34   : > { %600 = shalt.err (!%p597_p0)
}
  0x35   : > { %s689_s10 = smov 32   ;;  %s690_s20 = smov 2  }
  0x36   : > { %489 = dma.hbm_to_vmem [thread:$0]  (!%p790_p2), %s175_s26, 128, %s177_s4, %s165_s2, %s689_s10, %s689_s10, %s690_s20  }
  0x37   : > { %195 = sbr.rel (%p780_p12) target bundleno = 218 (0xda), region = 32  ;;  %s832_s7 = sand.u32 (!%p780_p12), 1, %s669_s13  }
  0x38   : > { %s454_s18 = sshll.u32 (!%p780_p12), %s832_s7, 3  ;;  %s198_s19 = scalar_lea.sflag (!%p780_p12), [#allocation3], %s832_s7 }
  0x39   : > { %s838_s22 = scalar_lea.vmem (!%p780_p12), [#allocation2], %s454_s18 }
  0x3c   : > { %652 = dma.done.wait (%p763_p7), %s198_s19, 128  }
  0x3d   : > { %654 = vsyncadd (%p763_p7), %s198_s19, 4294967168 }
  0x3e   : > { %656 = dma.done.wait (%p753_p3), [#allocation5], 16  }
  0x3f   : > { %658 = vsyncadd (%p753_p3), [#allocation5], 4294967280 }
  0x40   : > { %210 = sfence }
  0x41   : > { %p233_p12 = scmp.lt.s32.totalorder %s677_s15, 1  ;;  %v691_v0 = vmov 0   ;;  %s245_s21 = sld [smem:[#allocation6]]  ;;  %v237_v5 = vld [vmem:[%s838_s22] sm:$0x3] }
  0x42   : > { %553 = vset.pattern.permute.xlu1 %v691_v0  ;;  %552 = vset.pattern.permute.xlu0 %v691_v0  ;;  %s458_s27 = sld [smem:[#allocation6 + $0x1]]  ;;  %v238_v6 = vld [vmem:[%s838_s22 + $0x2] sm:$0x3]  ;;  %v239_v11 = vld [vmem:[%s838_s22 + $0x4] sm:$0x3]  ;;  %s232_s9 = scalar_lea.vmem [#allocation7], %s454_s18 }
  0x43   : > { %s234_s2 = scalar_select %p233_p12, %s677_s15, 1  ;;  %v240_v15 = vld [vmem:[%s838_s22 + $0x6] sm:$0x3] }
  0x44   : > { %s459_s4 = sld [smem:[#allocation6 + $0x2]]  ;;  %s336_s11 = sshll.u32 %s232_s9, 4  ;;  %s860_s11 = int_to_ptr.vmem [resolvable:$true] %s336_s11 }
  0x45   : > { %s457_s29 = sshll.u32 %s234_s2, 2  ;;  %s460_s28 = sld [smem:[#allocation6 + $0x3]] }
  0x46   : > { %s236_s26 = scalar_lea.vmem %s914_s1, %s457_s29  ;;  %s461_s6 = sld [smem:[#allocation6 + $0x4]] }
  0x47   : > { %v465_v1 = vld [vmem:[%s236_s26 + $0x2] ss:$0 sm:$0xff]  ;;  %v463_v2 = vld [vmem:[%s236_s26] ss:$0 sm:$0xff]  ;;  %v466_v3 = vld [vmem:[%s236_s26 + $0x3] ss:$0 sm:$0xff]  ;;  %v246_v7 = vstv %s245_s21 }
  0x48   : > { %298 = vperm.xlu1 %553, %v465_v1   ;;  %290 = vperm.xlu0 %552, %v463_v2   ;;  %v464_v4 = vld [vmem:[%s236_s26 + $0x1] ss:$0 sm:$0xff]  ;;  %v249_v8 = vstv %s458_s27  ;;  %v247_v9 = vmul.f32 %v246_v7, %v237_v5  ;;  %s473_s10 = sshll.u32 %s677_s15, 7  ;;  %s322_s15 = scalar_lea.sflag [#allocation4], %s832_s7 }
  0x49   : > { %v250_v10 = vmul.f32 %v249_v8, %v238_v6  ;;  %s865_s19 = scalar_lea.hbm %s916_s3, %s473_s10  ;;  %s601_s22 = scalar_lea.vmem %s860_s11, 128 }
  0x4a   : > { %v253_v12 = vstv %s459_s4  ;;  %p602_p3 = scmp.ne.s32.totalorder %s860_s11, %s601_s22  ;;  %p929_p7 = scmp.ne.s32.totalorder %s922_s24, 0 }
  0x4b   : > { %v251_v13 = vadd.f32 %v250_v10, %v247_v9  ;;  %v254_v14 = vmul.f32 %v253_v12, %v239_v11  ;;  %v257_v16 = vstv %s460_s28  ;;  %s692_s2 = smov [#allocation7]  }
  0x4c   : > { %302 = vperm.xlu1 %553, %v466_v3   ;;  %294 = vperm.xlu0 %552, %v464_v4   ;;  %v258_v18 = vmul.f32 %v257_v16, %v240_v15  ;;  %v261_v20 = vstv %s461_s6  ;;  %p603_p2 = pnand %p602_p3, %p929_p7  ;;  %s605_s29 = sshll.u32 %s692_s2, 4  ;;  %s606_s29 = int_to_ptr.vmem [resolvable:$false] %s605_s29 }
  0x4d   : > { %v255_v17 = vadd.f32 %v254_v14, %v251_v13  ;;  %s607_s30 = scalar_lea.vmem %s606_s29, 256  ;;  %p608_p10 = scmp.lt.s32.totalorder %s860_s11, %s606_s29 }
  0x4e   : > { %p604_p1 = pneg %p603_p2  ;;  %p609_p8 = scmp.lt.s32.totalorder %s607_s30, %s601_s22 }
  0x4f   : > { %v259_v19 = vadd.f32 %v258_v18, %v255_v17 }
  0x50   : > { %p610_p9 = por %p609_p8, %p608_p10 }
  0x51   : > { %v262_v21 = vadd.f32 %v261_v20, %v259_v19 }
  0x52   : > { %p611_p13 = pnand %p610_p9, %p604_p1 }
  0x53   : > { %v462_v22 = vmul.f32 -1.442695, %v262_v21 }
  0x55   : > { %554 = vpow2.f32 %v462_v22 }
  0x62   : > { %v555_v23 = vpop.eup %554 }
  0x63   : > { %v266_v24 = vadd.f32 1.0, %v555_v23 }
  0x65   : > { %556 = vrcp.f32 %v266_v24 }
  0x72   : > { %v557_v25 = vpop.eup %556 }
  0x73   : > { %v311_v26 = vmul.f32 %v557_v25, %v239_v11  ;;  %v309_v27 = vmul.f32 %v557_v25, %v237_v5  ;;  %v312_v34 = vmul.f32 %v557_v25, %v240_v15  ;;  %v310_v35 = vmul.f32 %v557_v25, %v238_v6 }
  0xc3   : > { %v299_v28 = vpop.permute.xlu1 %298  ;;  %v291_v29 = vpop.permute.xlu0 %290 }
  0xc4   : > { %v307_v30 = vmul.f32 %v299_v28, %v239_v11  ;;  %v305_v31 = vmul.f32 %v291_v29, %v237_v5 }
  0xc6   : > { %v315_v32 = vmax.f32 %v307_v30, %v311_v26  ;;  %v313_v33 = vmax.f32 %v305_v31, %v309_v27 }
  0xc7   : > { %v303_v36 = vpop.permute.xlu1 %302  ;;  %v295_v37 = vpop.permute.xlu0 %294 }
  0xc8   : > { %319 = vst [vmem:[%s232_s9 + $0x4] sm:$0x3] %v315_v32  ;;  %317 = vst [vmem:[%s232_s9] sm:$0x3] %v313_v33  ;;  %v308_v38 = vmul.f32 %v303_v36, %v240_v15  ;;  %v306_v39 = vmul.f32 %v295_v37, %v238_v6 }
  0xca   : > { %v316_v40 = vmax.f32 %v308_v38, %v312_v34  ;;  %v314_v41 = vmax.f32 %v306_v39, %v310_v35 }
  0xcc   : > { %320 = vst [vmem:[%s232_s9 + $0x6] sm:$0x3] %v316_v40  ;;  %318 = vst [vmem:[%s232_s9 + $0x2] sm:$0x3] %v314_v41 }
  0xcd   : > { %614 = shalt.err (!%p611_p13)
}
  0xce   : > { %s615_s23 = scalar_lea.hbm %s865_s19, 128  ;;  %s619_s27 = scalar_lea.hbm %s916_s3, 256 }
  0xcf   : > { %p616_p4 = scmp.ne.s32.totalorder %s865_s19, %s615_s23  ;;  %p620_p5 = scmp.lt.s32.totalorder %s865_s19, %s916_s3 }
  0xd0   : > { %p621_p0 = scmp.lt.s32.totalorder %s619_s27, %s615_s23 }
  0xd1   : > { %p617_p6 = pnand %p616_p4, %p929_p7 }
  0xd2   : > { %p622_p12 = por %p621_p0, %p620_p5 }
  0xd3   : > { %p618_p11 = pneg %p617_p6 }
  0xd5   : > { %p623_p3 = pnand %p622_p12, %p618_p11 }
  0xd7   : > { %626 = shalt.err (!%p623_p3)
}
  0xd8   : > { %s693_s6 = smov 32   ;;  %s694_s9 = smov 2  }
  0xd9   : > { %480 = dma.vmem_to_hbm [thread:$0]  (%p929_p7), %s860_s11, 128, %s865_s19, %s322_s15, %s693_s6, %s693_s6, %s694_s9  }
  0xda PF: > { %s351_s10 = sand.u32 1, %s665_s12   ;;  %p930_p2 = scmp.ne.s32.totalorder %s923_s25, 0 }
  0xdb   : > { %p931_p1 = scmp.ge.s32.totalorder %s685_s17, 2  ;;  %s352_s20 = scalar_lea.sflag [#allocation4], %s351_s10 }
  0xdd   : > { %p491_p10 = pnand %p931_p1, %p930_p2 }
  0xdf   : > { %p492_p8 = pneg %p491_p10 }
  0xe1   : > { %660 = dma.done.wait (%p492_p8), %s352_s20, 128  }
  0xe2   : > { %662 = vsyncadd (%p492_p8), %s352_s20, 4294967168  ;;  %s20_s17 = sadd.s32 1, %s685_s17   ;;  %s932_s12 = smov %s669_s13 }
  0xe3   : > { %p17_p9 = scmp.ge.s32.totalorder %s20_s17, 4   ;;  %s933_s13 = smov %s673_s14 }
  0xe4   : > { %s934_s14 = smov %s823_s8  ;;  %s935_s15 = smov %s681_s16 }
  0xe5   : > { %s936_s16 = smov %s938_s5  ;;  %19 = sbr.rel (!%p17_p9) target bundleno = 9 (0x9), region = 85 }
  0xea   :  { %357 = vsyncpa [#allocation3], 1 }
  0xeb   :  { %359 = vsyncpa [#allocation3 + $0x1], 1 }
  0xec   :  { %360 = vsyncpa [#allocation4], 1 }
  0xed   :  { %362 = vsyncpa [#allocation4 + $0x1], 1 }
  0xee   :  { %363 = vsyncpa [#allocation5], 1 }
  0xef   :  { %365 = vsyncpa [#allocation5 + $0x1], 1 }

</bundles_post_ra>
